<compile_context>
chip_gen: v7x
topology: tpu7x:2x2x1
jax: 0.10.0
libtpu: 0.0.40
codegen_flags: <defaults>
</compile_context>

<pallas_src>
import functools

import jax
import jax.numpy as jnp
from jax.experimental import pallas as pl
from jax.experimental.pallas import tpu as pltpu


_COMPUTE_DTYPE = jnp.bfloat16   # HBM activations / weights / MXU inputs / scratches
_ACC_DTYPE = jnp.float32        # accumulators, biases, residual math
_TILE_T_CAP = 512               # output time rows per grid step (multiple of 8)


def _round_up(n, m):
    return ((n + m - 1) // m) * m


def _pick_tile_t(t_out):
    # Full extent when small (always BlockSpec-legal), otherwise a multiple of 8.
    return t_out if t_out <= _TILE_T_CAP else _TILE_T_CAP


def _vmem_limit_bytes(est):
    # est already contains double-buffer factors; add headroom, cap below the
    # 64 MiB physical VMEM of v7x.
    return int(min(max(int(est) + (8 << 20), 32 << 20), 56 << 20))


def _py_weight_to_taps(w):
    # PyTorch Conv1d weight [Cout, Cin, K] -> per-tap matmul layout [K, Cin, Cout].
    return jnp.transpose(w, (2, 1, 0))


def _fold_down_weight(w, stride):
    """Strided Conv1d(W, W, 2*stride, stride, stride//2) -> 3 stride-1 taps.

    With the activation reshaped [T, W] -> [T//stride, stride*W] (free,
    row-major), the strided conv becomes a 3-tap stride-1 pad-1 conv whose tap
    matrices [stride*W, W] contain the original taps plus constant zero blocks
    (the zero blocks absorb the left/right zero padding of the original conv).
    """
    cout, cin, k = w.shape
    pad = stride // 2
    wt = jnp.transpose(w, (2, 1, 0))                      # [K, Cin, Cout]
    zero = jnp.zeros((cin, cout), w.dtype)
    taps = []
    for p in (-1, 0, 1):                                  # xr rows t-1, t, t+1
        blocks = []
        for q in range(stride):
            j = q + pad + p * stride
            blocks.append(wt[j] if 0 <= j < k else zero)
        taps.append(jnp.concatenate(blocks, axis=0))      # [stride*Cin, Cout]
    return jnp.stack(taps, axis=0)                        # [3, stride*Cin, Cout]


# ----------------------------- Pallas kernels ------------------------------

def _conv1d_kernel(*refs, taps, dilation, pad, tile_t, t_in, post_relu, has_emb):
    """K-tap stride-1 conv (+optional fused time-emb add, post-ReLU).

    Grid = (B, time-tiles).  A bf16 zero-padded copy of the (full-T, per-batch)
    input block is built in VMEM once per batch index (boundary rows only are
    zeroed); every output tile then loads ONE wide slab and accumulates K
    shifted-slice matmuls into an f32 VMEM accumulator.
    """
    if has_emb:
        x_ref, e_ref, w_ref, b_ref, o_ref, xp_ref, acc_ref = refs
    else:
        x_ref, w_ref, b_ref, o_ref, xp_ref, acc_ref = refs

    t_scr = xp_ref.shape[0]
    halo = dilation * (taps - 1)

    @pl.when(pl.program_id(1) == 0)
    def _build_padded():
        xv = x_ref[0]
        if has_emb:
            # Fused features + time_embedding (f32 add, then one bf16 round);
            # boundary rows stay zero, matching PyTorch's zero-pad of
            # (features + time_emb).
            xv = (xv.astype(jnp.float32) + e_ref[...]).astype(xp_ref.dtype)
        else:
            xv = xv.astype(xp_ref.dtype)
        if pad > 0:                                        # boundary-only zeroing
            xp_ref[0:pad, :] = jnp.zeros((pad, xp_ref.shape[1]), xp_ref.dtype)
        xp_ref[pad:pad + t_in, :] = xv
        tail = pad + t_in
        if t_scr > tail:
            xp_ref[tail:t_scr, :] = jnp.zeros((t_scr - tail, xp_ref.shape[1]),
                                              xp_ref.dtype)

    t0 = pl.program_id(1) * tile_t
    if tile_t % 8 == 0:
        t0 = pl.multiple_of(t0, 8)

    # One wide slab load per tile; taps are static slices of the loaded value.
    slab = xp_ref[pl.ds(t0, tile_t + halo), :]
    acc_ref[...] = jnp.dot(slab[0:tile_t, :], w_ref[0],
                           preferred_element_type=jnp.float32)
    for j in range(1, taps):
        acc_ref[...] += jnp.dot(slab[j * dilation:j * dilation + tile_t, :],
                                w_ref[j], preferred_element_type=jnp.float32)

    y = acc_ref[...] + b_ref[...]
    if post_relu:
        y = jnp.maximum(y, 0.0)
    o_ref[0] = y.astype(o_ref.dtype)


def _level_kernel(xr_ref, wd_ref, bd_ref, w1_ref, b1_ref, w2_ref, b2_ref,
                  o_ref, xp_ref, h_ref, hp_ref, acc_ref, *,
                  t_out, t_r, dilations, max_d):
    """Fused down-level: strided down-conv + `depth` ResConv1DBlocks.

    Grid = (B,).  The whole level runs on VMEM-resident buffers:
      xp_ref : padded, stride-folded input for the down-conv          (bf16)
      h_ref  : current activation with a zero halo of max(dilation)    (bf16)
      hp_ref : relu(h) / conv1-output staging buffer                   (bf16)
      acc_ref: f32 matmul accumulator
    """
    t_xp = xp_ref.shape[0]
    t_h = h_ref.shape[0]
    w = h_ref.shape[1]

    # --- padded stride-folded input (1 zero row each side) ---
    xp_ref[0:1, :] = jnp.zeros((1, xp_ref.shape[1]), xp_ref.dtype)
    xp_ref[1:1 + t_r, :] = xr_ref[0]
    if t_xp > 1 + t_r:
        xp_ref[1 + t_r:t_xp, :] = jnp.zeros((t_xp - 1 - t_r, xp_ref.shape[1]),
                                            xp_ref.dtype)

    # --- zero the halo rows of the activation buffer once per batch ---
    h_ref[0:max_d, :] = jnp.zeros((max_d, w), h_ref.dtype)
    if t_h > max_d + t_out:
        h_ref[max_d + t_out:t_h, :] = jnp.zeros((t_h - max_d - t_out, w),
                                                h_ref.dtype)

    # --- down-conv == 3-tap stride-1 conv over the stride-folded input ---
    acc_ref[...] = jnp.dot(xp_ref[0:t_out, :], wd_ref[0],
                           preferred_element_type=jnp.float32)
    acc_ref[...] += jnp.dot(xp_ref[1:1 + t_out, :], wd_ref[1],
                            preferred_element_type=jnp.float32)
    acc_ref[...] += jnp.dot(xp_ref[2:2 + t_out, :], wd_ref[2],
                            preferred_element_type=jnp.float32)
    h_ref[max_d:max_d + t_out, :] = (acc_ref[...] + bd_ref[...]).astype(h_ref.dtype)

    # --- depth x ResConv1DBlock: x + conv2_1x1(relu(conv1_dil3(relu(x)))) ---
    for bi, d in enumerate(dilations):
        # ReLU once per block (halo rows are zero and stay zero).
        hp_ref[...] = jnp.maximum(h_ref[...], 0)
        base = max_d - d
        acc_ref[...] = jnp.dot(hp_ref[base:base + t_out, :], w1_ref[3 * bi],
                               preferred_element_type=jnp.float32)
        acc_ref[...] += jnp.dot(hp_ref[base + d:base + d + t_out, :],
                                w1_ref[3 * bi + 1],
                                preferred_element_type=jnp.float32)
        acc_ref[...] += jnp.dot(hp_ref[base + 2 * d:base + 2 * d + t_out, :],
                                w1_ref[3 * bi + 2],
                                preferred_element_type=jnp.float32)
        h1 = jnp.maximum(acc_ref[...] + b1_ref[bi], 0.0)
        # Stage conv1 output (bf16) for the 1x1 conv; relu(h) is no longer needed.
        hp_ref[max_d:max_d + t_out, :] = h1.astype(hp_ref.dtype)
        y = jnp.dot(hp_ref[max_d:max_d + t_out, :], w2_ref[bi],
                    preferred_element_type=jnp.float32)
        y = y + b2_ref[bi] + h_ref[max_d:max_d + t_out, :].astype(jnp.float32)
        h_ref[max_d:max_d + t_out, :] = y.astype(h_ref.dtype)

    o_ref[0] = h_ref[max_d:max_d + t_out, :].astype(o_ref.dtype)


# ------------------------------ Wrappers --------------------------------

def _conv1d_stride1(x, w_taps, b, *, dilation=1, pad=0, post_relu=False,
                    emb=None, out_dtype=None):
    """K-tap stride-1 Conv1d over channels-last activations.

    x      : [B, T_in, Cin]   (bf16 activations in HBM)
    w_taps : [K, Cin, Cout]
    b      : [Cout]
    emb    : optional [T_in, Cin] f32 added to x (zero outside) before the conv.
    Padding of `pad` rows per side is applied inside the kernel (no HBM pad).
    Returns [B, T_out, Cout], T_out = T_in + 2*pad - dilation*(K-1).
    """
    B, T_in, Cin = x.shape
    K, Cin_w, Cout = w_taps.shape
    assert Cin_w == Cin
    halo = dilation * (K - 1)
    T_out = T_in + 2 * pad - halo
    assert T_out >= 1
    out_dtype = x.dtype if out_dtype is None else out_dtype

    tile_t = _pick_tile_t(T_out)
    nt = pl.cdiv(T_out, tile_t)
    t_scr = _round_up(nt * tile_t + halo, 8)

    w_taps = w_taps.astype(_COMPUTE_DTYPE)
    b_row = b.reshape(1, Cout).astype(_ACC_DTYPE)

    in_specs = [pl.BlockSpec((1, T_in, Cin), lambda bb, tt: (bb, 0, 0))]
    operands = [x.astype(_COMPUTE_DTYPE)]
    if emb is not None:
        in_specs.append(pl.BlockSpec((T_in, Cin), lambda bb, tt: (0, 0)))
        operands.append(emb.astype(_ACC_DTYPE))
    in_specs += [
        pl.BlockSpec((K, Cin, Cout), lambda bb, tt: (0, 0, 0)),   # resident weights
        pl.BlockSpec((1, Cout), lambda bb, tt: (0, 0)),
    ]
    operands += [w_taps, b_row]

    kernel = functools.partial(
        _conv1d_kernel, taps=K, dilation=dilation, pad=pad, tile_t=tile_t,
        t_in=T_in, post_relu=post_relu, has_emb=emb is not None)

    est = (2 * T_in * Cin * 2                                       # input (x2 buf)
           + (2 * T_in * Cin * 4 if emb is not None else 0)         # emb   (x2 buf)
           + 2 * tile_t * Cout * jnp.dtype(out_dtype).itemsize      # out   (x2 buf)
           + 2 * (w_taps.size * 2 + Cout * 4)                       # weights / bias
           + t_scr * Cin * 2 + tile_t * Cout * 4)                   # scratches

    return pl.pallas_call(
        kernel,
        out_shape=jax.ShapeDtypeStruct((B, T_out, Cout), out_dtype),
        grid=(B, nt),
        in_specs=in_specs,
        out_specs=pl.BlockSpec((1, tile_t, Cout), lambda bb, tt: (bb, tt, 0)),
        scratch_shapes=[pltpu.VMEM((t_scr, Cin), _COMPUTE_DTYPE),
                        pltpu.VMEM((tile_t, Cout), _ACC_DTYPE)],
        compiler_params=pltpu.CompilerParams(
            dimension_semantics=("parallel", "arbitrary"),
            vmem_limit_bytes=_vmem_limit_bytes(est)),
    )(*operands)


def _down_level(h, level_params, stride):
    """One fused down-level: strided down-conv + depth ResConv1DBlocks."""
    B, T_in, W = h.shape
    assert T_in % stride == 0, "sequence length must be divisible by stride_t"
    wd, bd = level_params["down"]                    # [W, W, 2*stride], [W]
    res = level_params["res"]
    depth = len(res)
    dilations = tuple(r["dilation"] for r in res)
    max_d = max(dilations)

    K = wd.shape[2]
    pad = stride // 2
    T_out = (T_in + 2 * pad - K) // stride + 1
    assert T_out >= 1
    T_r = T_in // stride
    CinL = stride * W

    # Free (row-major) reshape: [B, T_in, W] -> [B, T_in//stride, stride*W].
    xr = h.reshape(B, T_r, CinL)

    wd_taps = _fold_down_weight(wd, stride).astype(_COMPUTE_DTYPE)   # [3, CinL, W]
    bd_row = bd.reshape(1, W).astype(_ACC_DTYPE)
    w1 = jnp.stack([_py_weight_to_taps(r["conv1"][0]) for r in res], 0)
    w1 = w1.reshape(depth * 3, W, W).astype(_COMPUTE_DTYPE)          # [3*depth, W, W]
    b1 = jnp.stack([r["conv1"][1] for r in res], 0).reshape(depth, 1, W).astype(_ACC_DTYPE)
    w2 = jnp.stack([jnp.transpose(r["conv2"][0][:, :, 0], (1, 0)) for r in res],
                   0).astype(_COMPUTE_DTYPE)                          # [depth, W, W]
    b2 = jnp.stack([r["conv2"][1] for r in res], 0).reshape(depth, 1, W).astype(_ACC_DTYPE)

    t_xp = _round_up(T_r + 2, 8)
    t_h = _round_up(T_out + 2 * max_d, 8)

    est = (2 * T_r * CinL * 2 + 2 * T_out * W * 2                    # in/out (x2 buf)
           + 2 * (wd_taps.size + w1.size + w2.size) * 2              # weights (x2 buf)
           + 2 * (bd_row.size + b1.size + b2.size) * 4
           + t_xp * CinL * 2 + 2 * t_h * W * 2 + T_out * W * 4)      # scratches

    kernel = functools.partial(_level_kernel, t_out=T_out, t_r=T_r,
                               dilations=dilations, max_d=max_d)
    return pl.pallas_call(
        kernel,
        out_shape=jax.ShapeDtypeStruct((B, T_out, W), h.dtype),
        grid=(B,),
        in_specs=[
            pl.BlockSpec((1, T_r, CinL), lambda b: (b, 0, 0)),
            pl.BlockSpec((3, CinL, W), lambda b: (0, 0, 0)),
            pl.BlockSpec((1, W), lambda b: (0, 0)),
            pl.BlockSpec((depth * 3, W, W), lambda b: (0, 0, 0)),
            pl.BlockSpec((depth, 1, W), lambda b: (0, 0, 0)),
            pl.BlockSpec((depth, W, W), lambda b: (0, 0, 0)),
            pl.BlockSpec((depth, 1, W), lambda b: (0, 0, 0)),
        ],
        out_specs=pl.BlockSpec((1, T_out, W), lambda b: (b, 0, 0)),
        scratch_shapes=[
            pltpu.VMEM((t_xp, CinL), _COMPUTE_DTYPE),   # padded stride-folded input
            pltpu.VMEM((t_h, W), _COMPUTE_DTYPE),       # activation (+halo)
            pltpu.VMEM((t_h, W), _COMPUTE_DTYPE),       # relu(h) / conv1 staging
            pltpu.VMEM((T_out, W), _ACC_DTYPE),         # f32 accumulator
        ],
        compiler_params=pltpu.CompilerParams(
            dimension_semantics=("parallel",),
            vmem_limit_bytes=_vmem_limit_bytes(est)),
    )(xr, wd_taps, bd_row, w1, b1, w2, b2)


# --------------------------- Parameters / forward ---------------------------

def init_params(key, *, input_emb_width, output_emb_width, width, down_t,
                stride_t, depth, dilation_growth_rate, max_seq_length):
    def conv_init(k, cout, cin, ksz):
        k1, k2 = jax.random.split(k)
        bound = 1.0 / float(cin * ksz) ** 0.5
        w = jax.random.uniform(k1, (cout, cin, ksz), jnp.float32, -bound, bound)
        b = jax.random.uniform(k2, (cout,), jnp.float32, -bound, bound)
        return w, b

    keys = iter(jax.random.split(key, 256))
    filter_t = stride_t * 2

    params = {"stride_t": stride_t}
    params["conv_in"] = conv_init(next(keys), width, input_emb_width, 3)

    blocks = []
    for _ in range(down_t):
        down = conv_init(next(keys), width, width, filter_t)
        # Resnet1D (reference T2M-GPT impl): ResConv1DBlock with dilations
        # dilation_growth_rate**d for d in range(depth), reverse_dilation=True.
        dilations = [dilation_growth_rate ** d for d in range(depth)][::-1]
        res_blocks = []
        for dil in dilations:
            res_blocks.append({
                "dilation": dil,
                "conv1": conv_init(next(keys), width, width, 3),   # dilated 3-tap
                "conv2": conv_init(next(keys), width, width, 1),   # 1x1
            })
        blocks.append({"down": down, "res": res_blocks})
    params["blocks"] = blocks

    # nn.Embedding default init: N(0, 1)
    params["time_embedding"] = jax.random.normal(
        next(keys), (max_seq_length, width), jnp.float32)
    params["output_layer"] = conv_init(next(keys), output_emb_width, width, 3)
    return params


def temporal_autoregressive_encoder_forward(params, x_ncl, time_indices=None):
    """x_ncl: [B, input_emb_width, L] (PyTorch NCL) -> [B, output_emb_width, T_enc] f32."""
    stride_t = params["stride_t"]

    # NCL -> channels-last [B, L, C]; activations travel through HBM as bf16.
    h = jnp.transpose(x_ncl, (0, 2, 1)).astype(_COMPUTE_DTYPE)

    # base_encoder: Conv1d(Cin, W, 3, 1, 1) + ReLU (ReLU fused into the kernel).
    # TODO(synk): for tiny Cin the K*Cin im2col fold (review item) is skipped;
    # lane-density of the output (Cout=width) is what matters and is preserved.
    w, b = params["conv_in"]
    h = _conv1d_stride1(h, _py_weight_to_taps(w), b,
                        dilation=1, pad=1, post_relu=True)

    # down_t fused levels: strided Conv1d + full Resnet1D per pallas_call.
    for blk in params["blocks"]:
        h = _down_level(h, blk, stride_t)

    # features + time_embedding(arange(T_enc)), fused into the output conv.
    B, T_enc, W = h.shape
    assert T_enc <= params["time_embedding"].shape[0], (
        "sequence too long for time_embedding table")
    emb = params["time_embedding"][:T_enc]

    # NOTE: the PyTorch forward also recomputes time_embedding(arange(width))
    # after the transpose but never uses the result (dead code) — skipped.
    wo, bo = params["output_layer"]
    out = _conv1d_stride1(h, _py_weight_to_taps(wo), bo,
                          dilation=1, pad=1, post_relu=False,
                          emb=emb, out_dtype=jnp.float32)      # [B, T_enc, out_w]
    return jnp.transpose(out, (0, 2, 1))                        # [B, out_w, T_enc]


# ------------------------- Pure-JAX reference (f32) -------------------------

def _conv1d_ref(x, w, b, stride, pad, dilation):
    # x: [B, T, Cin] f32, w: [Cout, Cin, K], b: [Cout]
    B, T, Cin = x.shape
    Cout, _, K = w.shape
    xp = jnp.pad(x, ((0, 0), (pad, pad), (0, 0)))
    T_out = (T + 2 * pad - dilation * (K - 1) - 1) // stride + 1
    out = jnp.zeros((B, T_out, Cout), jnp.float32) + b
    for j in range(K):
        xs = xp[:, j * dilation:j * dilation + (T_out - 1) * stride + 1:stride, :]
        out = out + jnp.einsum("btc,cd->btd", xs, w[:, :, j].T,
                               precision="highest")
    return out


def _forward_ref(params, x_ncl):
    h = jnp.transpose(x_ncl, (0, 2, 1)).astype(jnp.float32)
    w, b = params["conv_in"]
    h = jax.nn.relu(_conv1d_ref(h, w, b, 1, 1, 1))
    s = params["stride_t"]
    for blk in params["blocks"]:
        wd, bd = blk["down"]
        h = _conv1d_ref(h, wd, bd, s, s // 2, 1)
        for r in blk["res"]:
            d = r["dilation"]
            w1, b1 = r["conv1"]
            w2, b2 = r["conv2"]
            t = _conv1d_ref(jax.nn.relu(h), w1, b1, 1, d, d)
            t = _conv1d_ref(jax.nn.relu(t), w2, b2, 1, 0, 1)
            h = h + t
    T_enc = h.shape[1]
    h = h + params["time_embedding"][:T_enc][None]
    wo, bo = params["output_layer"]
    out = _conv1d_ref(h, wo, bo, 1, 1, 1)
    return jnp.transpose(out, (0, 2, 1))


if __name__ == "__main__":
    key = jax.random.PRNGKey(0)
    kp, kx = jax.random.split(key)

    # Small config consistent with the module's constructor (width kept >=128
    # so output stores stay lane-dense, per the perf review).
    B, Cin, L = 2, 3, 16
    width, out_width = 128, 128
    down_t, stride_t, depth, growth = 2, 2, 2, 3
    max_seq_length = 64

    params = init_params(
        kp, input_emb_width=Cin, output_emb_width=out_width, width=width,
        down_t=down_t, stride_t=stride_t, depth=depth,
        dilation_growth_rate=growth, max_seq_length=max_seq_length)

    x = jax.random.normal(kx, (B, Cin, L), jnp.float32)
    out = temporal_autoregressive_encoder_forward(params, x)
    jax.block_until_ready(out)

    T_enc = L // (stride_t ** down_t)
    assert out.shape == (B, out_width, T_enc), out.shape
    assert bool(jnp.all(jnp.isfinite(out)))

    # Loose-tolerance check against the f32 pure-JAX reference (kernel path is bf16).
    ref = _forward_ref(params, x)
    err = float(jnp.max(jnp.abs(out - ref)) / (jnp.max(jnp.abs(ref)) + 1e-6))
    assert err < 0.1, f"normalized max error too large: {err}"

    print("KERNEL_OK")
</pallas_src>

<mosaic_0001>
module attributes {stable_mosaic.version = 11 : i64} {
  func.func @_conv1d_kernel(%arg0: i32, %arg1: i32, %arg2: memref<1x16x3xbf16, #tpu.memory_space<vmem>>, %arg3: memref<3x3x128xbf16, #tpu.memory_space<vmem>>, %arg4: memref<1x128xf32, #tpu.memory_space<vmem>>, %arg5: memref<1x16x128xbf16, #tpu.memory_space<vmem>>, %arg6: memref<24x3xbf16, #tpu.memory_space<vmem>>, %arg7: memref<16x128xf32, #tpu.memory_space<vmem>>) attributes {dimension_semantics = [#tpu.dimension_semantics<parallel>, #tpu.dimension_semantics<arbitrary>], iteration_bounds = array<i64: 2, 1>, scalar_prefetch = 0 : i64, scratch_operands = 2 : i64, tpu.core_type = #tpu.core_type<tc>, window_params = [{transform_indices = @transform_0, window_bounds = array<i64: 1, 16, 3>}, {pipeline_mode = #tpu.pipeline_mode<synchronous>, transform_indices = @transform_1, window_bounds = array<i64: 3, 3, 128>}, {pipeline_mode = #tpu.pipeline_mode<synchronous>, transform_indices = @transform_2, window_bounds = array<i64: 1, 128>}, {transform_indices = @transform_3, window_bounds = array<i64: 1, 16, 128>}]} {
    %c0_i32 = arith.constant 0 : i32
    %0 = arith.cmpi eq, %arg1, %c0_i32 : i32
    %1 = arith.extui %0 : i1 to i32
    %c0_i32_0 = arith.constant 0 : i32
    %2 = arith.cmpi ne, %1, %c0_i32_0 : i32
    scf.if %2 {
      %c0_28 = arith.constant 0 : index
      %c0_29 = arith.constant 0 : index
      %c0_30 = arith.constant 0 : index
      %36 = vector.load %arg2[%c0_28, %c0_29, %c0_30] : memref<1x16x3xbf16, #tpu.memory_space<vmem>>, vector<1x16x3xbf16>
      %37 = vector.shape_cast %36 : vector<1x16x3xbf16> to vector<16x3xbf16>
      %cst_31 = arith.constant 0.000000e+00 : bf16
      %38 = vector.broadcast %cst_31 : bf16 to vector<1x3xbf16>
      %c0_32 = arith.constant 0 : index
      %c0_33 = arith.constant 0 : index
      %39 = vector.load %arg6[%c0_32, %c0_33] : memref<24x3xbf16, #tpu.memory_space<vmem>>, vector<1x3xbf16>
      tpu.vector_store %arg6[%c0_32, %c0_33], %38 {strides = array<i32>} : memref<24x3xbf16, #tpu.memory_space<vmem>>, vector<1x3xbf16>,
      %c1_34 = arith.constant 1 : index
      %c0_35 = arith.constant 0 : index
      %40 = vector.load %arg6[%c1_34, %c0_35] : memref<24x3xbf16, #tpu.memory_space<vmem>>, vector<16x3xbf16>
      tpu.vector_store %arg6[%c1_34, %c0_35], %37 {strides = array<i32>} : memref<24x3xbf16, #tpu.memory_space<vmem>>, vector<16x3xbf16>,
      %cst_36 = arith.constant 0.000000e+00 : bf16
      %41 = vector.broadcast %cst_36 : bf16 to vector<7x3xbf16>
      %c17 = arith.constant 17 : index
      %c0_37 = arith.constant 0 : index
      %42 = vector.load %arg6[%c17, %c0_37] : memref<24x3xbf16, #tpu.memory_space<vmem>>, vector<7x3xbf16>
      tpu.vector_store %arg6[%c17, %c0_37], %41 {strides = array<i32>} : memref<24x3xbf16, #tpu.memory_space<vmem>>, vector<7x3xbf16>,
    } else {
    }
    %c16_i32 = arith.constant 16 : i32
    %3 = arith.muli %arg1, %c16_i32 : i32
    %4 = tpu.assume_multiple %3, 8 : i32
    %5 = arith.index_cast %4 : i32 to index
    %c0 = arith.constant 0 : index
    %6 = vector.load %arg6[%5, %c0] : memref<24x3xbf16, #tpu.memory_space<vmem>>, vector<18x3xbf16>
    %7 = vector.extract_strided_slice %6 {offsets = [0, 0], sizes = [16, 3], strides = [1, 1]} : vector<18x3xbf16> to vector<16x3xbf16>
    %c0_1 = arith.constant 0 : index
    %c0_2 = arith.constant 0 : index
    %c0_3 = arith.constant 0 : index
    %8 = vector.load %arg3[%c0_1, %c0_2, %c0_3] : memref<3x3x128xbf16, #tpu.memory_space<vmem>>, vector<1x3x128xbf16>
    %9 = vector.shape_cast %8 : vector<1x3x128xbf16> to vector<3x128xbf16>
    %cst = arith.constant dense<0.000000e+00> : vector<16x128xf32>
    %10 = tpu.matmul %7, %9, %cst {dimension_numbers = #tpu.dot_dimension_numbers<[1], [0], [0], [1], [0, 0, 1, 1], [], []>} : vector<16x3xbf16>, vector<3x128xbf16>, vector<16x128xf32> -> vector<16x128xf32>
    %c0_4 = arith.constant 0 : index
    %c0_5 = arith.constant 0 : index
    %11 = vector.load %arg7[%c0_4, %c0_5] : memref<16x128xf32, #tpu.memory_space<vmem>>, vector<16x128xf32>
    tpu.vector_store %arg7[%c0_4, %c0_5], %10 {strides = array<i32>} : memref<16x128xf32, #tpu.memory_space<vmem>>, vector<16x128xf32>,
    %c0_6 = arith.constant 0 : index
    %c0_7 = arith.constant 0 : index
    %12 = vector.load %arg7[%c0_6, %c0_7] : memref<16x128xf32, #tpu.memory_space<vmem>>, vector<16x128xf32>
    %13 = vector.extract_strided_slice %6 {offsets = [1, 0], sizes = [16, 3], strides = [1, 1]} : vector<18x3xbf16> to vector<16x3xbf16>
    %c1 = arith.constant 1 : index
    %c0_8 = arith.constant 0 : index
    %c0_9 = arith.constant 0 : index
    %14 = vector.load %arg3[%c1, %c0_8, %c0_9] : memref<3x3x128xbf16, #tpu.memory_space<vmem>>, vector<1x3x128xbf16>
    %15 = vector.shape_cast %14 : vector<1x3x128xbf16> to vector<3x128xbf16>
    %cst_10 = arith.constant dense<0.000000e+00> : vector<16x128xf32>
    %16 = tpu.matmul %13, %15, %cst_10 {dimension_numbers = #tpu.dot_dimension_numbers<[1], [0], [0], [1], [0, 0, 1, 1], [], []>} : vector<16x3xbf16>, vector<3x128xbf16>, vector<16x128xf32> -> vector<16x128xf32>
    %17 = arith.addf %12, %16 : vector<16x128xf32>
    %c0_11 = arith.constant 0 : index
    %c0_12 = arith.constant 0 : index
    %18 = vector.load %arg7[%c0_11, %c0_12] : memref<16x128xf32, #tpu.memory_space<vmem>>, vector<16x128xf32>
    tpu.vector_store %arg7[%c0_11, %c0_12], %17 {strides = array<i32>} : memref<16x128xf32, #tpu.memory_space<vmem>>, vector<16x128xf32>,
    %c0_13 = arith.constant 0 : index
    %c0_14 = arith.constant 0 : index
    %19 = vector.load %arg7[%c0_13, %c0_14] : memref<16x128xf32, #tpu.memory_space<vmem>>, vector<16x128xf32>
    %20 = vector.extract_strided_slice %6 {offsets = [2, 0], sizes = [16, 3], strides = [1, 1]} : vector<18x3xbf16> to vector<16x3xbf16>
    %c2 = arith.constant 2 : index
    %c0_15 = arith.constant 0 : index
    %c0_16 = arith.constant 0 : index
    %21 = vector.load %arg3[%c2, %c0_15, %c0_16] : memref<3x3x128xbf16, #tpu.memory_space<vmem>>, vector<1x3x128xbf16>
    %22 = vector.shape_cast %21 : vector<1x3x128xbf16> to vector<3x128xbf16>
    %cst_17 = arith.constant dense<0.000000e+00> : vector<16x128xf32>
    %23 = tpu.matmul %20, %22, %cst_17 {dimension_numbers = #tpu.dot_dimension_numbers<[1], [0], [0], [1], [0, 0, 1, 1], [], []>} : vector<16x3xbf16>, vector<3x128xbf16>, vector<16x128xf32> -> vector<16x128xf32>
    %24 = arith.addf %19, %23 : vector<16x128xf32>
    %c0_18 = arith.constant 0 : index
    %c0_19 = arith.constant 0 : index
    %25 = vector.load %arg7[%c0_18, %c0_19] : memref<16x128xf32, #tpu.memory_space<vmem>>, vector<16x128xf32>
    tpu.vector_store %arg7[%c0_18, %c0_19], %24 {strides = array<i32>} : memref<16x128xf32, #tpu.memory_space<vmem>>, vector<16x128xf32>,
    %c0_20 = arith.constant 0 : index
    %c0_21 = arith.constant 0 : index
    %26 = vector.load %arg7[%c0_20, %c0_21] : memref<16x128xf32, #tpu.memory_space<vmem>>, vector<16x128xf32>
    %c0_22 = arith.constant 0 : index
    %c0_23 = arith.constant 0 : index
    %27 = vector.load %arg4[%c0_22, %c0_23] : memref<1x128xf32, #tpu.memory_space<vmem>>, vector<1x128xf32>
    %28 = vector.broadcast %27 : vector<1x128xf32> to vector<16x128xf32>
    %29 = arith.addf %26, %28 : vector<16x128xf32>
    %cst_24 = arith.constant 0.000000e+00 : f32
    %30 = vector.broadcast %cst_24 : f32 to vector<16x128xf32>
    %31 = arith.maximumf %29, %30 : vector<16x128xf32>
    %32 = arith.truncf %31 : vector<16x128xf32> to vector<16x128xbf16>
    %c0_25 = arith.constant 0 : index
    %c0_26 = arith.constant 0 : index
    %c0_27 = arith.constant 0 : index
    %33 = vector.load %arg5[%c0_25, %c0_26, %c0_27] : memref<1x16x128xbf16, #tpu.memory_space<vmem>>, vector<1x16x128xbf16>
    %34 = vector.shape_cast %33 : vector<1x16x128xbf16> to vector<16x128xbf16>
    %35 = vector.shape_cast %32 : vector<16x128xbf16> to vector<1x16x128xbf16>
    tpu.vector_store %arg5[%c0_25, %c0_26, %c0_27], %35 {strides = array<i32>} : memref<1x16x128xbf16, #tpu.memory_space<vmem>>, vector<1x16x128xbf16>,
    return
  }
  func.func @transform_0(%arg0: i32, %arg1: i32) -> (i32, i32, i32) {
    %c0_i32 = arith.constant 0 : i32
    %c0_i32_0 = arith.constant 0 : i32
    %c0_i32_1 = arith.constant 0 : i32
    return %arg0, %c0_i32, %c0_i32_0 : i32, i32, i32
  }
  func.func @transform_1(%arg0: i32, %arg1: i32) -> (i32, i32, i32) {
    %c0_i32 = arith.constant 0 : i32
    %c0_i32_0 = arith.constant 0 : i32
    %c0_i32_1 = arith.constant 0 : i32
    %c0_i32_2 = arith.constant 0 : i32
    return %c0_i32, %c0_i32_0, %c0_i32_1 : i32, i32, i32
  }
  func.func @transform_2(%arg0: i32, %arg1: i32) -> (i32, i32) {
    %c0_i32 = arith.constant 0 : i32
    %c0_i32_0 = arith.constant 0 : i32
    %c0_i32_1 = arith.constant 0 : i32
    return %c0_i32, %c0_i32_0 : i32, i32
  }
  func.func @transform_3(%arg0: i32, %arg1: i32) -> (i32, i32, i32) {
    %c0_i32 = arith.constant 0 : i32
    %c0_i32_0 = arith.constant 0 : i32
    return %arg0, %arg1, %c0_i32 : i32, i32, i32
  }
}

</mosaic_0001>

<bundles_post_ra>
// kernel: tpu_custom_call.1
= control target key start
LH: loop header
LB: loop body
LE: loop exit
PB: predicated region body
PF: predicated region fallthrough
CT: control target
= control target key end

     0   :  { %8 = vsyncpa [#allocation5], 0  ;;  %s921_s0 = inlined_call_operand.vmem [shape: bf16[2,16,3], index: 0, kind: input, shape index: {}]   ;;  %s922_s1 = inlined_call_operand.vmem [shape: bf16[3,3,128], index: 1, kind: input, shape index: {}]   ;;  %s923_s2 = inlined_call_operand.vmem [shape: f32[1,128], index: 2, kind: input, shape index: {}]   ;;  %s924_s3 = inlined_call_operand.hbm [shape: bf16[2,16,128], index: 3, kind: output, shape index: {}]  }
   0x1   :  { %10 = vsyncpa [#allocation5 + $0x1], 0  ;;  %s768_s12 = smov 0   ;;  %s770_s13 = smov 0  }
   0x2   :  { %s772_s14 = smov 0   ;;  %s774_s15 = smov 0  }
   0x3   :  { %s776_s16 = smov 0   ;;  %s778_s17 = smov 0  }
   0x4 LB: > { %s544_s18 = sadd.s32 4294967295, %s740_s17   ;;  %s545_s19 = sadd.s32 4294967294, %s740_s17   ;;  %s740_s17 = sphi %s778_s17, %s16_s17   ;;  %s736_s16 = sphi %s776_s16, %s935_s16   ;;  %s732_s15 = sphi %s774_s15, %s934_s15   ;;  %s728_s14 = sphi %s772_s14, %s933_s14   ;;  %s724_s13 = sphi %s770_s13, %s932_s13   ;;  %s720_s12 = sphi %s768_s12, %s931_s12  }
   0x5   : > { %s28_s20 = sadd.s32 1, %s736_s16  ;;  %s105_s21 = sadd.s32 1, %s728_s14 }
   0x6   : > { %p30_p0 = scmp.ge.s32.totalorder %s28_s20, 2  ;;  %p115_p1 = scmp.ne.s32.totalorder %s728_s14, %s724_s13 }
   0x7   : > { %p116_p2 = scmp.eq.s32.totalorder %s544_s18, 1  ;;  %p121_p3 = scmp.ne.s32.totalorder %s724_s13, %s720_s12 }
   0x8   : > { %s937_s20 = smov (%p30_p0, %s28_s20), 0  ;;  %p122_p5 = scmp.eq.s32.totalorder %s545_s19, 1 }
   0x9   : > { %p808_p4 = por %p116_p2, %p115_p1  ;;  %s100_s23 = ssub.s32 %s736_s16, %s937_s20 }
   0xa   : > { %p548_p6 = scmp.ge.s32.totalorder %s740_s17, 1  ;;  %p103_p7 = scmp.eq.s32.totalorder %s100_s23, 0 }
   0xb   : > { %p815_p8 = por %p122_p5, %p121_p3  ;;  %p154_p9 = scmp.lt.s32.totalorder %s740_s17, 3 }
   0xc   : > { %s821_s25 = scalar_select %p103_p7, %s728_s14, %s105_s21  }
   0xd   : > { %p155_p10 = pnand %p548_p6, %p154_p9 }
   0xe   : > { %v241_v0 = vld [vmem:[%s922_s1] sm:$0x3] (!%p155_p10)  ;;  %vm251_vm0 = vcmask (!%p155_p10), 1040384   ;;  %vm252_vm1 = vcmask (!%p155_p10), 1041408   ;;  %v742_v1 = vmov (!%p155_p10), 0.0   ;;  %v743_v2 = vmov (!%p155_p10), 65535  }
   0xf   : > { %158 = sbr.rel (%p155_p10) target bundleno = 296 (0x128), region = 32  ;;  %582 = vmatprep.subr.bf16.mxu0 (!%p155_p10), %v742_v1  ;;  %v253_v3 = vsel (!%p155_p10), %vm251_vm0, 4294967295, %v743_v2  ;;  %p178_p11 = scmp.lt.s32.totalorder (!%p155_p10), %s732_s15, 1  ;;  %vm191_vm2 = vcmask (!%p155_p10), 16384   ;;  %588 = vmatprep.subr.bf16.mxu1 (!%p155_p10), %v742_v1  ;;  %vm744_vm3 = vmmov (!%p155_p10), 0   ;;  %vm219_vm7 = vcmask (!%p155_p10), 19456  }
  0x10   : > { %v254_v4 = vsel (!%p155_p10), %vm252_vm1, %v253_v3, 0  ;;  %584 = vmatprep.mubr.msk.bf16.mxu0 (!%p155_p10), %vm744_vm3, %v742_v1  ;;  %vm192_vm4 = vsmask.f32 (!%p155_p10), 256  ;;  %v194_v5 = vld [vmem:[#allocation2] sm:$0x1] (!%p155_p10)  ;;  %590 = vmatprep.mubr.msk.bf16.mxu1 (!%p155_p10), %vm744_vm3, %v742_v1  ;;  %vm247_vm11 = vcmask (!%p155_p10), 23552  }
  0x11   : > { %v256_v6 = vand.u32 (!%p155_p10), %v254_v4, %v241_v0  ;;  %vm831_vm5 = vmand (!%p155_p10), %vm191_vm2, %vm192_vm4  ;;  %v554_v9 = vld [vmem:[%s922_s1 + $0x2] sm:$0x3] (!%p155_p10)  ;;  %vm197_vm6 = vsmask.f32 (!%p155_p10), 4368  ;;  %vm220_vm8 = vsmask.f32 (!%p155_p10), 7938 }
  0x12   : > { %v195_v8 = vsel (!%p155_p10), %vm831_vm5, 0, %v194_v5  ;;  %v324_v10 = vand.u32 (!%p155_p10), %v554_v9, %v254_v4  ;;  %vm198_vm9 = vmor (!%p155_p10), %vm192_vm4, %vm197_vm6  ;;  %v227_v20 = vld [vmem:[#allocation2 + $0x8] sm:$0x1] (!%p155_p10)  ;;  %v557_v29 = vld [vmem:[%s922_s1 + $0x4] sm:$0x3] (!%p155_p10)  ;;  %vm375_vm12 = vcmask (!%p155_p10), 1046528  }
  0x13   : > { %583 = vmatpush3.bf16.msra.mxu0 (!%p155_p10), %v256_v6  ;;  %196 = vst [vmem:[#allocation2] sm:$0x1] (!%p155_p10), %v195_v8  ;;  %vm845_vm10 = vmand (!%p155_p10), %vm219_vm7, %vm220_vm8  ;;  %v383_v30 = vand.u32 (!%p155_p10), %v557_v29, %v254_v4  ;;  %vm308_vm13 = vsmask.f32 (!%p155_p10), 7424  ;;  %s175_s10 = sand.u32 (!%p155_p10), 1, %s724_s13   ;;  %s570_s21 = sshll.u32 (!%p155_p10), %s732_s15, 7 }
  0x14   : > { %594 = vmatprep.subr.bf16.mxu0 (!%p155_p10), %v742_v1  ;;  %589 = vmatpush3.bf16.msra.mxu1 (!%p155_p10), %v324_v10  ;;  %s549_s11 = sshll.u32 (!%p155_p10), %s175_s10, 3  ;;  %v559_v56 = vld [vmem:[%s923_s2] ss:$0 sm:$0xff] (!%p155_p10)  ;;  %s871_s29 = scalar_lea.hbm (!%p155_p10), %s924_s3, %s570_s21 }
  0x15   : > { %s177_s23 = scalar_lea.vmem (!%p155_p10), [#allocation4], %s549_s11  ;;  %s875_s30 = scalar_lea.sflag (!%p155_p10), [#allocation5], %s175_s10 }
  0x16   : > { %s179_s28 = scalar_select %p178_p11, %s732_s15, 1 }
  0x17   : > { %s469_s26 = sshll.u32 %s177_s23, 4  ;;  %s745_s15 = smov [#allocation4]   ;;  %s873_s26 = int_to_ptr.vmem [resolvable:$true] %s469_s26 }
  0x18   : > { %s567_s4 = sshll.u32 %s179_s28, 3  ;;  %s666_s5 = sshll.u32 %s745_s15, 4  ;;  %s667_s5 = int_to_ptr.vmem [resolvable:$false] %s666_s5 }
  0x19   : > { %s182_s7 = scalar_lea.vmem %s921_s0, %s567_s4  ;;  %s662_s4 = scalar_lea.vmem %s873_s26, 128 }
  0x1a   : > { %v189_v11 = vld [vmem:[%s182_s7] sm:$0xf]  ;;  %v190_v12 = vld [vmem:[%s182_s7 + $0x4] sm:$0xf]  ;;  %v222_v25 = vld [vmem:[#allocation2] sm:$0xf]  ;;  %p663_p12 = scmp.ne.s32.totalorder %s873_s26, %s662_s4  ;;  %p669_p1 = scmp.lt.s32.totalorder %s873_s26, %s667_s5 }
  0x1b   : > { %v200_v13 = vshrl.u32 %v189_v11, 16  ;;  %v203_v14 = vshll.u32 %v189_v11, 16  ;;  %v208_v15 = vshrl.u32 %v190_v12, 16  ;;  %v211_v16 = vshll.u32 %v190_v12, 16  ;;  %s668_s6 = scalar_lea.vmem %s667_s5, 256 }
  0x1c   : > { %p664_p13 = pnand %p663_p12, %p808_p4  ;;  %p670_p2 = scmp.lt.s32.totalorder %s668_s6, %s662_s4 }
  0x1d   : > { %v202_v17 = vrot.slane %v200_v13, 7  ;;  %v210_v18 = vrot.slane %v208_v15, 7 }
  0x1e   : > { %p665_p0 = pneg %p664_p13  ;;  %p671_p3 = por %p670_p2, %p669_p1 }
  0x1f   : > { %v205_v21 = vor.u32 %v203_v14, %v202_v17  ;;  %v206_v22 = vrot.slane %v202_v17, 4  ;;  %v213_v23 = vor.u32 %v211_v16, %v210_v18  ;;  %v215_v24 = vrot.slane %v210_v18, 4 }
  0x20   : > { %p672_p5 = pnand %p671_p3, %p665_p0 }
  0x21   : > { %v214_v26 = vsel %vm198_vm9, %v206_v22, %v213_v23  ;;  %v223_v27 = vsel %vm845_vm10, %v205_v21, %v222_v25  ;;  %v228_v28 = vsel %vm831_vm5, %v215_v24, %v227_v20 }
  0x22   : > { %224 = vst [vmem:[#allocation2] sm:$0xf] %v223_v27  ;;  %226 = vst.msk [vmem:[#allocation2 + $0x4] sm:$0xf] %vm219_vm7, %v214_v26 }
  0x23   : > { %229 = vst [vmem:[#allocation2 + $0x8] sm:$0x1] %v228_v28 }
  0x29   : > { %v660_v33 = vld [vmem:[#allocation2] sm:$0xff]  }
  0x2a   : > { %v230_v31 = vld [vmem:[#allocation2 + $0x8] sm:$0xf]  ;;  %585 = vmatmul.mubr.msk.bf16.vlgmr.msra.gmra.mrb[0].mxu0 %vm247_vm11, %v660_v33  ;;  %v311_v34 = vshll.u32 %v660_v33, 16  ;;  %v309_v35 = vshrl.u32 %v660_v33, 16  ;;  %v376_v38 = vrot.slane %v660_v33, 1 }
  0x2b   : > { %v231_v32 = vsel %vm845_vm10, 0, %v230_v31  ;;  %595 = vmatpush3.bf16.msra.mxu0 %v383_v30  ;;  %596 = vmatprep.mubr.msk.bf16.mxu0 %vm744_vm3, %v742_v1 }
  0x2c   : > { %232 = vst [vmem:[#allocation2 + $0x8] sm:$0xf] %v231_v32  ;;  %v313_v36 = vrot.slane %v311_v34, 1 }
  0x2e   : > { %v314_v40 = vor.u32 %v313_v36, %v309_v35 }
  0x33   : > { %v661_v37 = vld [vmem:[#allocation2 + $0x8] ss:$0 sps:$4 sm:$0x11]  }
  0x34   : > { %v377_v39 = vrot.slane %v661_v37, 1  ;;  %v316_v41 = vshll.u32 %v661_v37, 16 }
  0x36   : > { %v378_v42 = vsel %vm375_vm12, %v376_v38, %v377_v39  ;;  %v318_v43 = vrot.slane %v316_v41, 1 }
  0x37   : > { %597 = vmatmul.mubr.msk.bf16.vlgmr.msra.gmra.mrb[4].mxu0 %vm247_vm11, %v378_v42 }
  0x38   : > { %v319_v44 = vsel %vm308_vm13, %v314_v40, %v318_v43 }
  0x39   : > { %591 = vmatmul.mubr.msk.bf16.vlgmr.msra.gmra.mrb[0].mxu1 %vm247_vm11, %v319_v44 }
  0xfd   : > { %v292_v45 = vpop.f32.mrb[0].mxu0 }
  0xfe   : > { %v586_v46 = vpop.f32.mrb[1].mxu0 }
  0xff   : > { %v295_v47 = vpop.f32.mrb[2].mxu0 }
 0x100   : > { %v587_v48 = vpop.f32.mrb[3].mxu0 }
 0x10a   : > { %v419_v49 = vpop.f32.mrb[4].mxu0 }
 0x10b   : > { %v598_v50 = vpop.f32.mrb[5].mxu0 }
 0x10c   : > { %v360_v51 = vpop.f32.mrb[0].mxu1  ;;  %v422_v52 = vpop.f32.mrb[6].mxu0 }
 0x10d   : > { %v367_v53 = vadd.f32 %v360_v51, %v292_v45  ;;  %v592_v54 = vpop.f32.mrb[1].mxu1  ;;  %v599_v55 = vpop.f32.mrb[7].mxu0 }
 0x10e   : > { %v363_v57 = vpop.f32.mrb[2].mxu1 }
 0x10f   : > { %v426_v58 = vadd.f32 %v419_v49, %v367_v53  ;;  %v368_v59 = vadd.f32 %v363_v57, %v295_v47  ;;  %v593_v60 = vpop.f32.mrb[3].mxu1 }
 0x111   : > { %v439_v61 = vadd.f32 %v559_v56, %v426_v58  ;;  %v427_v62 = vadd.f32 %v422_v52, %v368_v59 }
 0x113   : > { %v440_v63 = vadd.f32 %v559_v56, %v427_v62  ;;  %v441_v0 = vmax.f32 %v439_v61, 0.0 }
 0x115   : > { %v442_v1 = vmax.f32 %v440_v63, 0.0 }
 0x117   : > { %v574_v2 = vpack.c.bf16 %v442_v1, %v441_v0 }
 0x119   : > { %575 = vst [vmem:[%s177_s23] sm:$0xff] %v574_v2  }
 0x11a   : > { %675 = shalt.err (!%p672_p5)
}
 0x11b   : > { %s676_s7 = scalar_lea.hbm %s871_s29, 128  ;;  %s680_s10 = scalar_lea.hbm %s924_s3, 256 }
 0x11c   : > { %p677_p6 = scmp.ne.s32.totalorder %s871_s29, %s676_s7  ;;  %p681_p10 = scmp.lt.u32.totalorder %s871_s29, %s924_s3 }
 0x11d   : > { %p682_p11 = scmp.lt.u32.totalorder %s680_s10, %s676_s7  ;;  %p684_p13 = scmp.lt.u32.totalorder %s676_s7, %s871_s29 }
 0x11e   : > { %p678_p7 = pnand %p677_p6, %p808_p4 }
 0x11f   : > { %p683_p12 = por %p682_p11, %p681_p10 }
 0x120   : > { %p679_p9 = pneg %p678_p7 }
 0x121   : > { %p685_p0 = por %p684_p13, %p683_p12 }
 0x123   : > { %p686_p1 = pnand %p685_p0, %p679_p9 }
 0x125   : > { %689 = shalt.err (!%p686_p1)
}
 0x126   : > { %s746_s19 = smov 64   ;;  %s747_s21 = smov 4  }
 0x127   : > { %600 = dma.vmem_to_hbm [thread:$0]  (%p808_p4), %s873_s26, 128, %s871_s29, %s875_s30, %s746_s19, %s746_s19, %s747_s21  }
 0x128 PF: > { %p606_p2 = scmp.ge.s32.totalorder %s740_s17, 2  ;;  %s484_s23 = sand.u32 1, %s720_s12  }
 0x129   : > { %s485_s27 = scalar_lea.sflag [#allocation5], %s484_s23 }
 0x12a   : > { %p603_p3 = pnand %p606_p2, %p815_p8 }
 0x12c   : > { %715 = dma.done.wait (!%p603_p3), %s485_s27, 128  }
 0x12d   : > { %717 = vsyncadd (!%p603_p3), %s485_s27, 4294967168  ;;  %s16_s17 = sadd.s32 1, %s740_s17   ;;  %s931_s12 = smov %s724_s13 }
 0x12e   : > { %p13_p5 = scmp.ge.s32.totalorder %s16_s17, 4   ;;  %s932_s13 = smov %s728_s14 }
 0x12f   : > { %s933_s14 = smov %s821_s25  ;;  %s934_s15 = smov %s736_s16 }
 0x130   : > { %s935_s16 = smov %s937_s20  ;;  %15 = sbr.rel (!%p13_p5) target bundleno = 4 (0x4), region = 74 }
 0x137   :  { %490 = vsyncpa [#allocation5], 1 }
 0x138   :  { %492 = vsyncpa [#allocation5 + $0x1], 1 }

</bundles_post_ra>
